<compile_context>
chip_gen: v7x
topology: tpu7x:2x2x1
jax: 0.10.0
libtpu: 0.0.40
codegen_flags: <defaults>
</compile_context>

<pallas_src>
import functools

import jax
import jax.numpy as jnp
from jax.experimental import pallas as pl
from jax.experimental.pallas import tpu as pltpu


def _round_up(x, m):
    return ((x + m - 1) // m) * m


# ---------------- layer 1: H = dropout(relu(A_hat @ (X @ W1) + b1)) ----------------
def gcn_layer1_kernel(a_ref, x_ref, w_ref, b_ref, mask_ref, h_ref, acc_ref):
    k = pl.program_id(1)

    @pl.when(k == 0)
    def _():
        acc_ref[...] = jnp.zeros_like(acc_ref)

    # Stage X[k-tile] @ W once per k step, then contract with the A_hat row tile.
    xw = jnp.dot(x_ref[...], w_ref[...], preferred_element_type=jnp.float32)
    acc_ref[...] += jnp.dot(a_ref[...], xw.astype(jnp.bfloat16),
                            preferred_element_type=jnp.float32)

    @pl.when(k == pl.num_programs(1) - 1)
    def _():
        z = acc_ref[...] + b_ref[...]                 # bias (f32)
        h = jnp.maximum(z, 0.0) * mask_ref[...]       # fused ReLU + dropout (mask is 0 or 1/(1-p))
        h_ref[...] = h.astype(h_ref.dtype)            # bf16 out -> feeds layer-2 MXU directly


# ------------- layer 2: out = log_softmax(A_hat @ (H @ W2) + b2, axis=1) ------------
def gcn_layer2_kernel(a_ref, x_ref, w_ref, b_ref, out_ref, acc_ref, *, n_classes):
    k = pl.program_id(1)

    @pl.when(k == 0)
    def _():
        acc_ref[...] = jnp.zeros_like(acc_ref)

    xw = jnp.dot(x_ref[...], w_ref[...], preferred_element_type=jnp.float32)
    acc_ref[...] += jnp.dot(a_ref[...], xw.astype(jnp.bfloat16),
                            preferred_element_type=jnp.float32)

    @pl.when(k == pl.num_programs(1) - 1)
    def _():
        z = acc_ref[...] + b_ref[...]                           # (TM, Cpad) f32
        col = jax.lax.broadcasted_iota(jnp.int32, z.shape, 1)
        valid = col < n_classes                                 # mask padded class lanes
        zm = jnp.where(valid, z, -1e30)
        m = jnp.max(zm, axis=1, keepdims=True)
        e = jnp.where(valid, jnp.exp(zm - m), 0.0)
        s = jnp.sum(e, axis=1, keepdims=True)
        out_ref[...] = jnp.where(valid, zm - (m + jnp.log(s)), 0.0)


def _gcn_layer_call(kernel, a, x, w, b, extra, out_dtype, tm, tk):
    """One GCN layer: out[i] = epilogue( sum_k A[i,k] @ (X[k] @ W) + b )."""
    npad = a.shape[0]
    fpad = x.shape[1]
    hpad = w.shape[1]
    grid = (npad // tm, npad // tk)

    in_specs = [
        pl.BlockSpec((tm, tk), lambda i, k: (i, k)),        # A_hat row/col tile (bf16)
        pl.BlockSpec((tk, fpad), lambda i, k: (k, 0)),      # X k-tile (bf16)
        pl.BlockSpec((fpad, hpad), lambda i, k: (0, 0)),    # W, resident (bf16)
        pl.BlockSpec((1, hpad), lambda i, k: (0, 0)),       # bias (f32)
    ]
    operands = [a, x, w, b]
    for arr in extra:                                       # dropout mask (layer 1 only)
        in_specs.append(pl.BlockSpec((tm, hpad), lambda i, k: (i, 0)))
        operands.append(arr)

    flops = 2 * npad * fpad * hpad * grid[0] + 2 * npad * npad * hpad
    bytes_accessed = (a.size * a.dtype.itemsize
                      + x.size * x.dtype.itemsize * grid[0]
                      + w.size * w.dtype.itemsize
                      + npad * hpad * 4)

    return pl.pallas_call(
        kernel,
        out_shape=jax.ShapeDtypeStruct((npad, hpad), out_dtype),
        grid=grid,
        in_specs=in_specs,
        out_specs=pl.BlockSpec((tm, hpad), lambda i, k: (i, 0)),
        scratch_shapes=[pltpu.VMEM((tm, hpad), jnp.float32)],
        compiler_params=pltpu.CompilerParams(
            dimension_semantics=("parallel", "arbitrary"),
            vmem_limit_bytes=64 * 1024 * 1024),
        cost_estimate=pl.CostEstimate(
            flops=flops, transcendentals=npad * hpad, bytes_accessed=bytes_accessed),
    )(*operands)


def gcn_forward(x, a_hat, w1, b1, w2, b2, dropout_key, p=0.5, training=True):
    n, f = x.shape
    h = w1.shape[1]
    c = w2.shape[1]

    # Row tile: 128 for real sizes, else the (bf16-sublane-aligned) padded node count.
    tm = 128 if n >= 128 else _round_up(n, 16)
    tk = tm
    npad = _round_up(n, tm)
    fpad = _round_up(f, 128)
    hpad = _round_up(h, 128)
    cpad = _round_up(c, 128)

    # Zero-pad to lane-dense shapes; bf16 for MXU inputs, f32 for biases.
    a_p = jnp.zeros((npad, npad), jnp.float32).at[:n, :n].set(a_hat).astype(jnp.bfloat16)
    x_p = jnp.zeros((npad, fpad), jnp.float32).at[:n, :f].set(x).astype(jnp.bfloat16)
    w1_p = jnp.zeros((fpad, hpad), jnp.float32).at[:f, :h].set(w1).astype(jnp.bfloat16)
    b1_p = jnp.zeros((1, hpad), jnp.float32).at[:, :h].set(b1)
    w2_p = jnp.zeros((hpad, cpad), jnp.float32).at[:h, :c].set(w2).astype(jnp.bfloat16)
    b2_p = jnp.zeros((1, cpad), jnp.float32).at[:, :c].set(b2)

    # Dropout mask (F.dropout defaults: p=0.5, training=True), built in plain JAX.
    if training and p > 0.0:
        keep = jax.random.bernoulli(dropout_key, 1.0 - p, (npad, hpad))
        mask = keep.astype(jnp.float32) * (1.0 / (1.0 - p))
    else:
        mask = jnp.ones((npad, hpad), jnp.float32)

    h_p = _gcn_layer_call(gcn_layer1_kernel, a_p, x_p, w1_p, b1_p, [mask],
                          jnp.bfloat16, tm, tk)
    out_p = _gcn_layer_call(functools.partial(gcn_layer2_kernel, n_classes=c),
                            a_p, h_p, w2_p, b2_p, [], jnp.float32, tm, tk)
    return out_p[:n, :c]


def normalized_adjacency(edge_index, n):
    """D^{-1/2} (A + I) D^{-1/2} as a dense (n, n) float32 matrix (GCNConv norm)."""
    src, dst = edge_index[0], edge_index[1]
    a = jnp.zeros((n, n), jnp.float32).at[dst, src].set(1.0)
    a = a + jnp.eye(n, dtype=jnp.float32)
    deg = jnp.sum(a, axis=1)
    dinv = jax.lax.rsqrt(deg)
    return a * dinv[:, None] * dinv[None, :]


def glorot(key, shape):
    fan_in, fan_out = shape
    limit = (6.0 / (fan_in + fan_out)) ** 0.5
    return jax.random.uniform(key, shape, jnp.float32, -limit, limit)


if __name__ == "__main__":
    N, DIM, HIDDEN, N_CLASSES = 8, 32, 16, 4

    key = jax.random.PRNGKey(0)
    k_x, k_w1, k_w2, k_drop = jax.random.split(key, 4)

    # node features (N, dim)
    x = jax.random.normal(k_x, (N, DIM), dtype=jnp.float32)

    # deterministic edge_index: bidirectional ring + a couple of chords, shape (2, E)
    fwd = jnp.stack([jnp.arange(N), (jnp.arange(N) + 1) % N])
    chords = jnp.array([[0, 2, 4], [4, 6, 1]])
    e = jnp.concatenate([fwd, chords], axis=1)
    edge_index = jnp.concatenate([e, e[::-1]], axis=1).astype(jnp.int32)

    a_hat = normalized_adjacency(edge_index, N)

    # GCNConv parameters (glorot weights, zero biases, matching PyG defaults)
    w1 = glorot(k_w1, (DIM, HIDDEN))
    b1 = jnp.zeros((1, HIDDEN), jnp.float32)
    w2 = glorot(k_w2, (HIDDEN, N_CLASSES))
    b2 = jnp.zeros((1, N_CLASSES), jnp.float32)

    out = gcn_forward(x, a_hat, w1, b1, w2, b2, k_drop)
    jax.block_until_ready(out)

    assert out.shape == (N, N_CLASSES)
    # rows of log_softmax should exponentiate-sum to ~1
    assert jnp.allclose(jnp.exp(out).sum(axis=1), 1.0, atol=1e-3)
    print("KERNEL_OK")
</pallas_src>

<mosaic_0001>
module attributes {stable_mosaic.version = 11 : i64} {
  func.func @gcn_layer1_kernel(%arg0: i32, %arg1: i32, %arg2: memref<16x16xbf16, #tpu.memory_space<vmem>>, %arg3: memref<16x128xbf16, #tpu.memory_space<vmem>>, %arg4: memref<128x128xbf16, #tpu.memory_space<vmem>>, %arg5: memref<1x128xf32, #tpu.memory_space<vmem>>, %arg6: memref<16x128xf32, #tpu.memory_space<vmem>>, %arg7: memref<16x128xbf16, #tpu.memory_space<vmem>>, %arg8: memref<16x128xf32, #tpu.memory_space<vmem>>) attributes {dimension_semantics = [#tpu.dimension_semantics<parallel>, #tpu.dimension_semantics<arbitrary>], iteration_bounds = array<i64: 1, 1>, scalar_prefetch = 0 : i64, scratch_operands = 1 : i64, tpu.core_type = #tpu.core_type<tc>, window_params = [{transform_indices = @transform_0, window_bounds = array<i64: 16, 16>}, {transform_indices = @transform_1, window_bounds = array<i64: 16, 128>}, {pipeline_mode = #tpu.pipeline_mode<synchronous>, transform_indices = @transform_2, window_bounds = array<i64: 128, 128>}, {pipeline_mode = #tpu.pipeline_mode<synchronous>, transform_indices = @transform_3, window_bounds = array<i64: 1, 128>}, {transform_indices = @transform_4, window_bounds = array<i64: 16, 128>}, {transform_indices = @transform_5, window_bounds = array<i64: 16, 128>}]} {
    %c0_i32 = arith.constant 0 : i32
    %0 = arith.cmpi eq, %arg1, %c0_i32 : i32
    %1 = arith.extui %0 : i1 to i32
    %c0_i32_0 = arith.constant 0 : i32
    %2 = arith.cmpi ne, %1, %c0_i32_0 : i32
    scf.if %2 {
      %cst_13 = arith.constant 0.000000e+00 : f32
      %15 = vector.broadcast %cst_13 : f32 to vector<16x128xf32>
      %c0_14 = arith.constant 0 : index
      %c0_15 = arith.constant 0 : index
      %16 = vector.load %arg8[%c0_14, %c0_15] : memref<16x128xf32, #tpu.memory_space<vmem>>, vector<16x128xf32>
      tpu.vector_store %arg8[%c0_14, %c0_15], %15 {strides = array<i32>} : memref<16x128xf32, #tpu.memory_space<vmem>>, vector<16x128xf32>,
    } else {
    }
    %c0 = arith.constant 0 : index
    %c0_1 = arith.constant 0 : index
    %3 = vector.load %arg3[%c0, %c0_1] : memref<16x128xbf16, #tpu.memory_space<vmem>>, vector<16x128xbf16>
    %c0_2 = arith.constant 0 : index
    %c0_3 = arith.constant 0 : index
    %4 = vector.load %arg4[%c0_2, %c0_3] : memref<128x128xbf16, #tpu.memory_space<vmem>>, vector<128x128xbf16>
    %cst = arith.constant dense<0.000000e+00> : vector<16x128xf32>
    %5 = tpu.matmul %3, %4, %cst {dimension_numbers = #tpu.dot_dimension_numbers<[1], [0], [0], [1], [0, 0, 1, 1], [], []>} : vector<16x128xbf16>, vector<128x128xbf16>, vector<16x128xf32> -> vector<16x128xf32>
    %c0_4 = arith.constant 0 : index
    %c0_5 = arith.constant 0 : index
    %6 = vector.load %arg8[%c0_4, %c0_5] : memref<16x128xf32, #tpu.memory_space<vmem>>, vector<16x128xf32>
    %c0_6 = arith.constant 0 : index
    %c0_7 = arith.constant 0 : index
    %7 = vector.load %arg2[%c0_6, %c0_7] : memref<16x16xbf16, #tpu.memory_space<vmem>>, vector<16x16xbf16>
    %8 = arith.truncf %5 : vector<16x128xf32> to vector<16x128xbf16>
    %cst_8 = arith.constant dense<0.000000e+00> : vector<16x128xf32>
    %9 = tpu.matmul %7, %8, %cst_8 {dimension_numbers = #tpu.dot_dimension_numbers<[1], [0], [0], [1], [0, 0, 1, 1], [], []>} : vector<16x16xbf16>, vector<16x128xbf16>, vector<16x128xf32> -> vector<16x128xf32>
    %10 = arith.addf %6, %9 : vector<16x128xf32>
    %c0_9 = arith.constant 0 : index
    %c0_10 = arith.constant 0 : index
    %11 = vector.load %arg8[%c0_9, %c0_10] : memref<16x128xf32, #tpu.memory_space<vmem>>, vector<16x128xf32>
    tpu.vector_store %arg8[%c0_9, %c0_10], %10 {strides = array<i32>} : memref<16x128xf32, #tpu.memory_space<vmem>>, vector<16x128xf32>,
    %c0_i32_11 = arith.constant 0 : i32
    %12 = arith.cmpi eq, %arg1, %c0_i32_11 : i32
    %13 = arith.extui %12 : i1 to i32
    %c0_i32_12 = arith.constant 0 : i32
    %14 = arith.cmpi ne, %13, %c0_i32_12 : i32
    scf.if %14 {
      %c0_13 = arith.constant 0 : index
      %c0_14 = arith.constant 0 : index
      %15 = vector.load %arg8[%c0_13, %c0_14] : memref<16x128xf32, #tpu.memory_space<vmem>>, vector<16x128xf32>
      %c0_15 = arith.constant 0 : index
      %c0_16 = arith.constant 0 : index
      %16 = vector.load %arg5[%c0_15, %c0_16] : memref<1x128xf32, #tpu.memory_space<vmem>>, vector<1x128xf32>
      %17 = vector.broadcast %16 : vector<1x128xf32> to vector<16x128xf32>
      %18 = arith.addf %15, %17 : vector<16x128xf32>
      %cst_17 = arith.constant 0.000000e+00 : f32
      %19 = vector.broadcast %cst_17 : f32 to vector<16x128xf32>
      %20 = arith.maximumf %18, %19 : vector<16x128xf32>
      %c0_18 = arith.constant 0 : index
      %c0_19 = arith.constant 0 : index
      %21 = vector.load %arg6[%c0_18, %c0_19] : memref<16x128xf32, #tpu.memory_space<vmem>>, vector<16x128xf32>
      %22 = arith.mulf %20, %21 : vector<16x128xf32>
      %23 = arith.truncf %22 : vector<16x128xf32> to vector<16x128xbf16>
      %c0_20 = arith.constant 0 : index
      %c0_21 = arith.constant 0 : index
      %24 = vector.load %arg7[%c0_20, %c0_21] : memref<16x128xbf16, #tpu.memory_space<vmem>>, vector<16x128xbf16>
      tpu.vector_store %arg7[%c0_20, %c0_21], %23 {strides = array<i32>} : memref<16x128xbf16, #tpu.memory_space<vmem>>, vector<16x128xbf16>,
    } else {
    }
    return
  }
  func.func @transform_0(%arg0: i32, %arg1: i32) -> (i32, i32) {
    %c0_i32 = arith.constant 0 : i32
    return %arg0, %arg1 : i32, i32
  }
  func.func @transform_1(%arg0: i32, %arg1: i32) -> (i32, i32) {
    %c0_i32 = arith.constant 0 : i32
    %c0_i32_0 = arith.constant 0 : i32
    return %arg1, %c0_i32 : i32, i32
  }
  func.func @transform_2(%arg0: i32, %arg1: i32) -> (i32, i32) {
    %c0_i32 = arith.constant 0 : i32
    %c0_i32_0 = arith.constant 0 : i32
    %c0_i32_1 = arith.constant 0 : i32
    return %c0_i32, %c0_i32_0 : i32, i32
  }
  func.func @transform_3(%arg0: i32, %arg1: i32) -> (i32, i32) {
    %c0_i32 = arith.constant 0 : i32
    %c0_i32_0 = arith.constant 0 : i32
    %c0_i32_1 = arith.constant 0 : i32
    return %c0_i32, %c0_i32_0 : i32, i32
  }
  func.func @transform_4(%arg0: i32, %arg1: i32) -> (i32, i32) {
    %c0_i32 = arith.constant 0 : i32
    %c0_i32_0 = arith.constant 0 : i32
    return %arg0, %c0_i32 : i32, i32
  }
  func.func @transform_5(%arg0: i32, %arg1: i32) -> (i32, i32) {
    %c0_i32 = arith.constant 0 : i32
    %c0_i32_0 = arith.constant 0 : i32
    return %arg0, %c0_i32 : i32, i32
  }
}

</mosaic_0001>

<bundles_post_ra>
// kernel: tpu_custom_call.1
= control target key start
LH: loop header
LB: loop body
LE: loop exit
PB: predicated region body
PF: predicated region fallthrough
CT: control target
= control target key end

     0   :  { %10 = vsyncpa [#allocation4], 0  ;;  %s676_s0 = inlined_call_operand.hbm [shape: bf16[16,16], index: 0, kind: input, shape index: {}]   ;;  %s677_s1 = inlined_call_operand.hbm [shape: bf16[16,128], index: 1, kind: input, shape index: {}]   ;;  %s678_s2 = inlined_call_operand.hbm [shape: bf16[128,128], index: 2, kind: input, shape index: {}]   ;;  %s679_s3 = inlined_call_operand.hbm [shape: f32[1,128], index: 3, kind: input, shape index: {}]   ;;  %s680_s4 = inlined_call_operand.hbm [shape: f32[16,128], index: 4, kind: input, shape index: {}]   ;;  %s681_s5 = inlined_call_operand.hbm [shape: bf16[16,128], index: 5, kind: output, shape index: {}]  }
   0x1   :  { %11 = vsyncpa [#allocation7], 0 }
   0x2   :  { %12 = vsyncpa [#allocation10], 0 }
   0x3   :  { %13 = vsyncpa [#allocation5], 0  ;;  %s535_s18 = smov [#allocation6]   ;;  %s536_s20 = smov [#allocation9]  }
   0x4   :  { %s31_s19 = sshll.u32 %s535_s18, 4  ;;  %s56_s21 = sshll.u32 %s536_s20, 4  ;;  %s32_s19 = int_to_ptr.vmem [resolvable:$true] %s31_s19  ;;  %s577_s21 = int_to_ptr.vmem [resolvable:$true] %s56_s21 }
   0x5   :  { %s395_s24 = scalar_lea.hbm %s677_s1, 128 }
   0x6   :  { %p396_p0 = scmp.ne.s32.totalorder %s677_s1, %s395_s24  ;;  %p399_p1 = scmp.lt.u32.totalorder %s395_s24, %s677_s1 }
   0x8   :  { %p401_p2 = pnand %p399_p1, %p396_p0 }
   0xa   :  { %404 = shalt.err (!%p401_p2)
}
   0xb   :  { %s405_s29 = scalar_lea.vmem %s32_s19, 128  ;;  %p410_p4 = scmp.lt.s32.totalorder %s32_s19, %s32_s19 }
   0xc   :  { %p406_p3 = scmp.ne.s32.totalorder %s32_s19, %s405_s29  ;;  %p411_p5 = scmp.lt.s32.totalorder %s405_s29, %s405_s29 }
   0xe   :  { %p412_p6 = por %p411_p5, %p410_p4 }
  0x10   :  { %p413_p7 = pnand %p412_p6, %p406_p3 }
  0x12   :  { %416 = shalt.err (!%p413_p7)
}
  0x13   :  { %s537_s30 = smov 64   ;;  %s538_s6 = smov 4  }
  0x14   :  { %37 = dma.hbm_to_vmem [thread:$0]  %s677_s1, 128, %s32_s19, [#allocation7], %s537_s30, %s537_s30, %s538_s6  }
  0x15   :  { %s417_s11 = scalar_lea.hbm %s679_s3, 16 }
  0x16   :  { %p418_p8 = scmp.ne.s32.totalorder %s679_s3, %s417_s11  ;;  %p421_p9 = scmp.lt.u32.totalorder %s417_s11, %s679_s3 }
  0x18   :  { %p423_p10 = pnand %p421_p9, %p418_p8 }
  0x1a   :  { %426 = shalt.err (!%p423_p10)
}
  0x1b   :  { %s427_s16 = scalar_lea.vmem %s577_s21, 16  ;;  %s431_s1 = scalar_lea.vmem %s577_s21, 32 }
  0x1c   :  { %p428_p11 = scmp.ne.s32.totalorder %s577_s21, %s427_s16  ;;  %p432_p12 = scmp.lt.s32.totalorder %s577_s21, %s577_s21 }
  0x1d   :  { %p433_p13 = scmp.lt.s32.totalorder %s431_s1, %s427_s16 }
  0x1f   :  { %p434_p0 = por %p433_p13, %p432_p12 }
  0x21   :  { %p435_p1 = pnand %p434_p0, %p428_p11 }
  0x23   :  { %438 = shalt.err (!%p435_p1)
}
  0x24   :  { %59 = dma.hbm_to_vmem [thread:$0]  %s679_s3, 16, %s577_s21, [#allocation10]  }
  0x25   :  { %s539_s19 = smov [#allocation3]   ;;  %s540_s22 = smov [#allocation8]  }
  0x26   :  { %s19_s20 = sshll.u32 %s539_s19, 4  ;;  %s43_s23 = sshll.u32 %s540_s22, 4  ;;  %s20_s20 = int_to_ptr.vmem [resolvable:$true] %s19_s20  ;;  %s612_s23 = int_to_ptr.vmem [resolvable:$true] %s43_s23 }
  0x27   :  { %s439_s26 = scalar_lea.hbm %s676_s0, 128 }
  0x28   :  { %p440_p2 = scmp.ne.s32.totalorder %s676_s0, %s439_s26  ;;  %p443_p3 = scmp.lt.u32.totalorder %s439_s26, %s676_s0 }
  0x2a   :  { %p445_p4 = pnand %p443_p3, %p440_p2 }
  0x2c   :  { %448 = shalt.err (!%p445_p4)
}
  0x2d   :  { %s449_s3 = scalar_lea.vmem %s20_s20, 128  ;;  %p454_p6 = scmp.lt.s32.totalorder %s20_s20, %s20_s20 }
  0x2e   :  { %p450_p5 = scmp.ne.s32.totalorder %s20_s20, %s449_s3  ;;  %p455_p7 = scmp.lt.s32.totalorder %s449_s3, %s449_s3 }
  0x30   :  { %p456_p8 = por %p455_p7, %p454_p6 }
  0x32   :  { %p457_p9 = pnand %p456_p8, %p450_p5 }
  0x34   :  { %460 = shalt.err (!%p457_p9)
}
  0x35   :  { %25 = dma.hbm_to_vmem [thread:$0]  %s676_s0, 128, %s20_s20, [#allocation4], %s537_s30, %s537_s30, %s538_s6  }
  0x36   :  { %s461_s11 = scalar_lea.hbm %s678_s2, 1024 }
  0x37   :  { %p462_p10 = scmp.ne.s32.totalorder %s678_s2, %s461_s11  ;;  %p465_p11 = scmp.lt.u32.totalorder %s461_s11, %s678_s2 }
  0x39   :  { %p467_p12 = pnand %p465_p11, %p462_p10 }
  0x3b   :  { %470 = shalt.err (!%p467_p12)
}
  0x3c   :  { %s471_s16 = scalar_lea.vmem %s612_s23, 1024  ;;  %p476_p0 = scmp.lt.s32.totalorder %s612_s23, %s612_s23 }
  0x3d   :  { %p472_p13 = scmp.ne.s32.totalorder %s612_s23, %s471_s16  ;;  %p477_p1 = scmp.lt.s32.totalorder %s471_s16, %s471_s16 }
  0x3f   :  { %p478_p2 = por %p477_p1, %p476_p0 }
  0x41   :  { %p479_p3 = pnand %p478_p2, %p472_p13 }
  0x43   :  { %482 = shalt.err (!%p479_p3)
}
  0x44   :  { %49 = dma.hbm_to_vmem [thread:$0]  %s678_s2, 1024, %s612_s23, [#allocation7], %s537_s30, %s537_s30, %s538_s6  }
  0x45   :  { %s541_s17 = smov [#allocation11]   ;;  %s483_s22 = scalar_lea.hbm %s680_s4, 256 }
  0x46   :  { %s65_s18 = sshll.u32 %s541_s17, 4  ;;  %p484_p4 = scmp.ne.s32.totalorder %s680_s4, %s483_s22  ;;  %s66_s18 = int_to_ptr.vmem [resolvable:$true] %s65_s18 }
  0x47   :  { %p487_p5 = scmp.lt.u32.totalorder %s483_s22, %s680_s4 }
  0x49   :  { %p489_p6 = pnand %p487_p5, %p484_p4 }
  0x4b   :  { %492 = shalt.err (!%p489_p6)
}
  0x4c   :  { %s493_s28 = scalar_lea.vmem %s66_s18, 256  ;;  %p498_p8 = scmp.lt.s32.totalorder %s66_s18, %s66_s18 }
  0x4d   :  { %p494_p7 = scmp.ne.s32.totalorder %s66_s18, %s493_s28  ;;  %p499_p9 = scmp.lt.s32.totalorder %s493_s28, %s493_s28 }
  0x4f   :  { %p500_p10 = por %p499_p9, %p498_p8 }
  0x51   :  { %p501_p11 = pnand %p500_p10, %p494_p7 }
  0x53   :  { %504 = shalt.err (!%p501_p11)
}
  0x54   :  { %s542_s2 = smov 128   ;;  %s543_s23 = smov 8  }
  0x55   :  { %71 = dma.hbm_to_vmem [thread:$0]  %s680_s4, 256, %s66_s18, [#allocation10], %s542_s2, %s542_s2, %s543_s23  }
  0x56   :  { %527 = dma.done.wait [#allocation4], 128  }
  0x57   :  { %528 = vsyncadd [#allocation4], 4294967168 }
  0x58   :  { %529 = dma.done.wait [#allocation7], 1152  }
  0x59   :  { %530 = vsyncadd [#allocation7], 4294966144 }
  0x5a   :  { %531 = dma.done.wait [#allocation10], 272  }
  0x5b   :  { %532 = vsyncadd [#allocation10], 4294967024  ;;  %v544_v0 = vmov 0.0   ;;  %vm545_vm0 = vmmov 0   ;;  %v385_v1 = vld [vmem:[#allocation8] sm:$0xff]   ;;  %v386_v2 = vld [vmem:[#allocation8 + $0x8] sm:$0xff]  }
  0x5c   :  { %347 = vmatprep.subr.bf16.mxu0 %v544_v0  ;;  %363 = vmatprep.mubr.msk.bf16.mxu0 %vm545_vm0, %v544_v0  ;;  %v387_v3 = vld [vmem:[#allocation8 + $0x10] sm:$0xff]   ;;  %v388_v4 = vld [vmem:[#allocation8 + $0x18] sm:$0xff]   ;;  %v389_v5 = vld [vmem:[#allocation8 + $0x20] sm:$0xff]   ;;  %vm217_vm1 = vcmask 130048   ;;  %s546_s4 = smov [#allocation12]  }
  0x5d   :  { %367 = vmatprep.subr.bf16.mxu1 %v544_v0  ;;  %369 = vmatprep.mubr.msk.bf16.mxu1 %vm545_vm0, %v544_v0  ;;  %v390_v6 = vld [vmem:[#allocation8 + $0x28] sm:$0xff]   ;;  %v391_v7 = vld [vmem:[#allocation8 + $0x30] sm:$0xff]   ;;  %v392_v8 = vld [vmem:[#allocation8 + $0x38] sm:$0xff]   ;;  %s301_s3 = sshll.u32 %s546_s4, 4  ;;  %s302_s3 = int_to_ptr.vmem [resolvable:$true] %s301_s3 }
  0x5e   :  { %348 = vmatpush3.bf16.msra.mxu0 %v385_v1  ;;  %v393_v9 = vld [vmem:[#allocation6] sm:$0xff]   ;;  %v394_v15 = vld [vmem:[#allocation3] sm:$0xff]   ;;  %v326_v16 = vld [vmem:[#allocation9] ss:$0 sm:$0xff]  ;;  %s505_s21 = scalar_lea.vmem %s302_s3, 128  ;;  %p510_p13 = scmp.lt.s32.totalorder %s302_s3, %s302_s3 }
  0x5f   :  { %349 = vmatprep.subr.bf16.mxu0 %v544_v0  ;;  %v282_v24 = vld [vmem:[#allocation11] sm:$0xff]  ;;  %v283_v25 = vld [vmem:[#allocation11 + $0x8] sm:$0xff]  ;;  %p506_p12 = scmp.ne.s32.totalorder %s302_s3, %s505_s21  ;;  %p511_p0 = scmp.lt.s32.totalorder %s505_s21, %s505_s21 }
  0x61   :  { %p512_p1 = por %p511_p0, %p510_p13 }
  0x62   :  { %350 = vmatpush3.bf16.msra.mxu0 %v386_v2 }
  0x63   :  { %351 = vmatprep.subr.bf16.mxu0 %v544_v0  ;;  %p513_p2 = pnand %p512_p1, %p506_p12 }
  0x66   :  { %352 = vmatpush3.bf16.msra.mxu0 %v387_v3 }
  0x67   :  { %353 = vmatprep.subr.bf16.mxu0 %v544_v0 }
  0x6a   :  { %354 = vmatpush3.bf16.msra.mxu0 %v388_v4 }
  0x6b   :  { %355 = vmatprep.subr.bf16.mxu0 %v544_v0 }
  0x6e   :  { %356 = vmatpush3.bf16.msra.mxu0 %v389_v5 }
  0x6f   :  { %357 = vmatprep.subr.bf16.mxu0 %v544_v0 }
  0x72   :  { %358 = vmatpush3.bf16.msra.mxu0 %v390_v6 }
  0x73   :  { %359 = vmatprep.subr.bf16.mxu0 %v544_v0 }
  0x76   :  { %360 = vmatpush3.bf16.msra.mxu0 %v391_v7 }
  0x77   :  { %361 = vmatprep.subr.bf16.mxu0 %v544_v0 }
  0x7a   :  { %362 = vmatpush3.bf16.msra.mxu0 %v392_v8 }
  0x7d   :  { %364 = vmatmul.mubr.bf16.vlgmr.msra.gmra.mrb[0].mxu0 %v393_v9 }
 0x150   :  { %v200_v10 = vpop.f32.mrb[0].mxu0 }
 0x151   :  { %v365_v11 = vpop.f32.mrb[1].mxu0 }
 0x152   :  { %v203_v12 = vpop.f32.mrb[2].mxu0 }
 0x153   :  { %v211_v13 = vpack.c.bf16 %v203_v12, %v200_v10  ;;  %v366_v14 = vpop.f32.mrb[3].mxu0 }
 0x155   :  { %368 = vmatpush3.bf16.msra.mxu1 %v211_v13 }
 0x158   :  { %370 = vmatmul.mubr.msk.bf16.vlgmr.msra.gmra.mrb[0].mxu1 %vm217_vm1, %v394_v15 }
 0x22b   :  { %v255_v17 = vpop.f32.mrb[0].mxu1 }
 0x22c   :  { %v278_v18 = vadd.f32 %v326_v16, %v255_v17  ;;  %v371_v19 = vpop.f32.mrb[1].mxu1 }
 0x22d   :  { %v258_v20 = vpop.f32.mrb[2].mxu1 }
 0x22e   :  { %v280_v21 = vmax.f32 %v278_v18, 0.0  ;;  %v279_v22 = vadd.f32 %v326_v16, %v258_v20  ;;  %v372_v23 = vpop.f32.mrb[3].mxu1 }
 0x230   :  { %v281_v26 = vmax.f32 %v279_v22, 0.0  ;;  %v284_v27 = vmul.f32 %v282_v24, %v280_v21 }
 0x232   :  { %v285_v28 = vmul.f32 %v283_v25, %v281_v26 }
 0x234   :  { %v334_v29 = vpack.c.bf16 %v285_v28, %v284_v27 }
 0x236   :  { %335 = vst [vmem:[#allocation12] sm:$0xff] %v334_v29  }
 0x237   :  { %516 = shalt.err (!%p513_p2)
}
 0x238   :  { %s517_s10 = scalar_lea.hbm %s681_s5, 128 }
 0x239   :  { %p518_p3 = scmp.ne.s32.totalorder %s681_s5, %s517_s10  ;;  %p521_p4 = scmp.lt.u32.totalorder %s517_s10, %s681_s5 }
 0x23b   :  { %p523_p5 = pnand %p521_p4, %p518_p3 }
 0x23d   :  { %526 = shalt.err (!%p523_p5)
}
 0x23e   :  { %307 = dma.vmem_to_hbm [thread:$0]  %s302_s3, 128, %s681_s5, [#allocation5], %s537_s30, %s537_s30, %s538_s6  }
 0x23f   :  { %533 = dma.done.wait [#allocation5], 128  }
 0x240   :  { %534 = vsyncadd [#allocation5], 4294967168 }
 0x241   :  { %311 = vsyncpa [#allocation4], 1 }
 0x242   :  { %312 = vsyncpa [#allocation7], 1 }
 0x243   :  { %313 = vsyncpa [#allocation10], 1 }
 0x244   :  { %314 = vsyncpa [#allocation5], 1 }

</bundles_post_ra>
